<compile_context>
chip_gen: v6e
topology: v6e:2x2x1
jax: 0.10.0
libtpu: 0.0.40
codegen_flags: <defaults>
</compile_context>

<pallas_src>
import jax
import jax.numpy as jnp
from jax import lax
from jax.experimental import pallas as pl
from jax.experimental.pallas import tpu as pltpu

_MAX_IN_FLIGHT = 4                       # round-robin DMA semaphores per core
_DEFAULT_SLAB_BYTES = 6 * 1024 * 1024    # broadcast-slab budget (safe on v5e/v6e/v7x)
_VMEM_LIMIT_BYTES = 32 * 1024 * 1024


# ----------------------------------------------------------------------------- template
def build_prompt_template(token_prefix, token_suffix, n_ctx):
    """Pack frozen CLIP embeddings into the (N, L, D) output layout ONCE (init-time).

    Rows [1, 1+n_ctx) are placeholders the kernel overwrites every forward call.
    """
    n, one, d = token_prefix.shape
    assert one == 1, token_prefix.shape
    assert token_suffix.shape[0] == n and token_suffix.shape[2] == d, token_suffix.shape
    dtype = token_prefix.dtype
    ctx_rows = jnp.zeros((n, n_ctx, d), dtype=dtype)
    return jnp.concatenate([token_prefix, ctx_rows, token_suffix.astype(dtype)], axis=1)


# ----------------------------------------------------------------------------- kernels
def _make_shared_ctx_kernel(n, bn, n_ctx, d, nblk_per_core, n_sems):
    """ctx is (n_ctx, D): broadcast once into VMEM, fire all block DMAs, drain."""

    def kernel(ctx_ref, tmpl_ref, out_ref, bcast_ref, sems):
        del tmpl_ref  # frozen bytes already live in the aliased output buffer

        # Fill the broadcast slab once per core.  Re-done on each grid step so the
        # kernel stays correct when the grid axis is sharded across TensorCores.
        bcast_ref[...] = jnp.broadcast_to(ctx_ref[...][None, :, :], (bn, n_ctx, d))
        blk0 = pl.program_id(0) * nblk_per_core

        def dma(i0, slot):
            # All copies have identical shape, so the same descriptor shape is also
            # valid for .wait() regardless of which block it was issued for.
            return pltpu.make_async_copy(
                bcast_ref,
                out_ref.at[pl.ds(i0, bn), pl.ds(1, n_ctx), :],
                sems.at[slot])

        def block_start(b):
            # Clamp the (possibly ragged / out-of-range) block start; overlapping
            # blocks re-write identical bytes, which is safe.
            return jnp.minimum((blk0 + b) * bn, n - bn)

        if nblk_per_core <= n_sems:
            # Everything fits in flight at once: issue all, then drain all.
            for b in range(nblk_per_core):
                dma(block_start(b), b).start()
            for b in range(nblk_per_core):
                dma(0, b).wait()
        else:
            # Prime all semaphore slots, then steady-state wait(slot)/reissue(slot),
            # finally drain the last n_sems outstanding copies.
            for b in range(n_sems):
                dma(block_start(b), b).start()

            def body(b, carry):
                slot = b % n_sems
                dma(0, slot).wait()
                dma(block_start(b), slot).start()
                return carry

            lax.fori_loop(n_sems, nblk_per_core, body, 0)
            for t in range(n_sems):
                dma(0, (nblk_per_core - n_sems + t) % n_sems).wait()

    return kernel


def _make_per_prompt_ctx_kernel(n, rows, n_ctx):
    """ctx is (N, n_ctx, D): one direct HBM->HBM strided DMA per grid step."""

    def kernel(ctx_ref, tmpl_ref, out_ref, sem):
        del tmpl_ref
        i0 = jnp.minimum(pl.program_id(0) * rows, n - rows)
        cp = pltpu.make_async_copy(
            ctx_ref.at[pl.ds(i0, rows), :, :],
            out_ref.at[pl.ds(i0, rows), pl.ds(1, n_ctx), :],
            sem.at[0])
        cp.start()
        cp.wait()

    return kernel


# ----------------------------------------------------------------------------- wrapper
def prompt_learner_forward(ctx, template, *, slab_budget_bytes=_DEFAULT_SLAB_BYTES):
    """prompts = concat([prefix, ctx, suffix], dim=-2), written in place into `template`.

    ctx:      (n_ctx, D) shared learned context, or (N, n_ctx, D) per-prompt context
    template: (N, L, D) frozen prefix/suffix bytes from build_prompt_template()
    returns   (N, L, D) prompts, buffer-aliased with `template`.

    The template must be DONATED at the jit boundary for the alias to be in-place
    (use `prompt_learner_forward_jit`); otherwise XLA copies the whole template into
    the aliased output every call, re-introducing the traffic this kernel removes.
    """
    n, seq_len, d = template.shape
    if ctx.ndim == 2:
        n_ctx, d_c = ctx.shape
    else:
        assert ctx.ndim == 3 and ctx.shape[0] == n, ctx.shape
        n_ctx, d_c = ctx.shape[1], ctx.shape[2]
    assert d_c == d, (ctx.shape, template.shape)
    assert seq_len >= 1 + n_ctx, (seq_len, n_ctx)

    # Explicit cast: the learned ctx may be a wider dtype than the frozen embeddings;
    # a DMA cannot cast (and torch.cat requires a single dtype anyway).
    ctx = ctx.astype(template.dtype)
    itemsize = jnp.dtype(template.dtype).itemsize

    # At most one grid step per TensorCore; "parallel" lets v7x shard them.
    num_cores = 2 if n >= 2 else 1
    grid = (num_cores,)

    if ctx.ndim == 2:
        per_prompt_bytes = max(n_ctx * d * itemsize, 1)
        # Prompts per DMA block: as large as the slab budget allows, but small enough
        # that every core gets at least one real (non-redundant) block.
        bn = max(1, min(slab_budget_bytes // per_prompt_bytes, pl.cdiv(n, num_cores)))
        nblk_total = pl.cdiv(n, bn)
        nblk_per_core = pl.cdiv(nblk_total, num_cores)
        kernel = _make_shared_ctx_kernel(n, bn, n_ctx, d, nblk_per_core, _MAX_IN_FLIGHT)
        ctx_spec = pl.BlockSpec((n_ctx, d), lambda i: (0, 0))      # tiny, auto-DMA'd
        scratch = [pltpu.VMEM((bn, n_ctx, d), template.dtype),
                   pltpu.SemaphoreType.DMA((_MAX_IN_FLIGHT,))]
    else:
        rows = pl.cdiv(n, num_cores)
        kernel = _make_per_prompt_ctx_kernel(n, rows, n_ctx)
        ctx_spec = pl.BlockSpec(memory_space=pl.ANY)               # stays in HBM
        scratch = [pltpu.SemaphoreType.DMA((1,))]

    return pl.pallas_call(
        kernel,
        out_shape=jax.ShapeDtypeStruct((n, seq_len, d), template.dtype),
        grid_spec=pltpu.PrefetchScalarGridSpec(
            num_scalar_prefetch=0,
            grid=grid,
            in_specs=[
                ctx_spec,
                pl.BlockSpec(memory_space=pl.ANY),      # frozen template, stays in HBM
            ],
            out_specs=pl.BlockSpec(memory_space=pl.ANY),  # written in place via DMA
            scratch_shapes=scratch),
        input_output_aliases={1: 0},                      # template buffer == output
        compiler_params=pltpu.CompilerParams(
            dimension_semantics=("parallel",),
            vmem_limit_bytes=_VMEM_LIMIT_BYTES),
    )(ctx, template)


# Donating the template is REQUIRED for true in-place behavior.
prompt_learner_forward_jit = jax.jit(
    prompt_learner_forward,
    donate_argnums=(1,),
    static_argnames=("slab_budget_bytes",))


# ----------------------------------------------------------------------------- demo / check
if __name__ == "__main__":
    # Small shapes consistent with the module: 10 prompts (awkward, non-power-of-two),
    # n_ctx=8 context tokens, ctx_dim=128 (lane-dense), L = 1 + 8 + 15 = 24.
    n_cls, n_ctx, ctx_dim, suffix_len = 10, 8, 128, 15
    seq_len = 1 + n_ctx + suffix_len

    key = jax.random.PRNGKey(0)
    k_ctx, k_ctx2, k_ctx3, k_pre, k_suf = jax.random.split(key, 5)

    # ctx ~ N(0, 0.02): matches nn.init.normal_(ctx_vectors, std=0.02)
    ctx = 0.02 * jax.random.normal(k_ctx, (n_ctx, ctx_dim), dtype=jnp.float32)
    ctx2 = 0.02 * jax.random.normal(k_ctx2, (n_ctx, ctx_dim), dtype=jnp.float32)
    ctx3 = 0.02 * jax.random.normal(k_ctx3, (n_cls, n_ctx, ctx_dim), dtype=jnp.float32)
    # Frozen CLIP token embeddings (token_prefix / token_suffix buffers).
    token_prefix = jax.random.normal(k_pre, (n_cls, 1, ctx_dim), dtype=jnp.float32)
    token_suffix = jax.random.normal(k_suf, (n_cls, suffix_len, ctx_dim), dtype=jnp.float32)

    def reference(c):
        cb = jnp.broadcast_to(c[None], (n_cls, n_ctx, ctx_dim)) if c.ndim == 2 else c
        return jnp.concatenate([token_prefix, cb, token_suffix], axis=1)

    # --- shared (2-D) ctx, default budget: one block per core, all DMAs in flight.
    template = build_prompt_template(token_prefix, token_suffix, n_ctx)
    prompts = jax.block_until_ready(prompt_learner_forward_jit(ctx, template))
    assert prompts.shape == (n_cls, seq_len, ctx_dim), prompts.shape
    assert jnp.allclose(prompts, reference(ctx)), "mismatch (shared ctx, call 1)"

    # Second TTA step with an updated ctx, reusing the output buffer as the template.
    prompts = jax.block_until_ready(prompt_learner_forward_jit(ctx2, prompts))
    assert jnp.allclose(prompts, reference(ctx2)), "mismatch (shared ctx, call 2)"

    # --- shared ctx, tiny slab budget: multi-block + ragged clamped final block.
    per_prompt_bytes = n_ctx * ctx_dim * 4
    tmpl_b = build_prompt_template(token_prefix, token_suffix, n_ctx)
    prompts_b = jax.block_until_ready(
        prompt_learner_forward_jit(ctx, tmpl_b,
                                   slab_budget_bytes=3 * per_prompt_bytes))
    assert jnp.allclose(prompts_b, reference(ctx)), "mismatch (ragged block path)"

    # --- shared ctx, 1-prompt blocks: exercises the >4-in-flight fori_loop pipeline.
    tmpl_c = build_prompt_template(token_prefix, token_suffix, n_ctx)
    prompts_c = jax.block_until_ready(
        prompt_learner_forward_jit(ctx2, tmpl_c,
                                   slab_budget_bytes=per_prompt_bytes))
    assert jnp.allclose(prompts_c, reference(ctx2)), "mismatch (pipelined path)"

    # --- per-prompt (3-D) ctx: direct HBM->HBM scatter.
    template3 = build_prompt_template(token_prefix, token_suffix, n_ctx)
    prompts3 = jax.block_until_ready(prompt_learner_forward_jit(ctx3, template3))
    assert jnp.allclose(prompts3, reference(ctx3)), "mismatch (per-prompt ctx)"

    print("KERNEL_OK")
</pallas_src>

<mosaic_0001>
module attributes {stable_mosaic.version = 11 : i64} {
  func.func @kernel(%arg0: i32, %arg1: memref<8x128xf32, #tpu.memory_space<vmem>>, %arg2: memref<10x24x128xf32, #tpu.memory_space<any>>, %arg3: memref<10x24x128xf32, #tpu.memory_space<any>>, %arg4: memref<5x8x128xf32, #tpu.memory_space<vmem>>, %arg5: memref<4x!tpu.dma_semaphore, #tpu.memory_space<semaphore_mem>>) attributes {dimension_semantics = [#tpu.dimension_semantics<parallel>], iteration_bounds = array<i64: 2>, scalar_prefetch = 0 : i64, scratch_operands = 2 : i64, tpu.core_type = #tpu.core_type<tc>, window_params = [{pipeline_mode = #tpu.pipeline_mode<synchronous>, transform_indices = @transform_0, window_bounds = array<i64: 8, 128>}, {}, {}]} {
    %c0 = arith.constant 0 : index
    %c0_0 = arith.constant 0 : index
    %0 = vector.load %arg1[%c0, %c0_0] : memref<8x128xf32, #tpu.memory_space<vmem>>, vector<8x128xf32>
    %1 = vector.shape_cast %0 : vector<8x128xf32> to vector<1x8x128xf32>
    %2 = vector.shape_cast %1 : vector<1x8x128xf32> to vector<1x8x128xf32>
    %3 = vector.broadcast %2 : vector<1x8x128xf32> to vector<5x8x128xf32>
    %c0_1 = arith.constant 0 : index
    %c0_2 = arith.constant 0 : index
    %c0_3 = arith.constant 0 : index
    %4 = vector.load %arg4[%c0_1, %c0_2, %c0_3] : memref<5x8x128xf32, #tpu.memory_space<vmem>>, vector<5x8x128xf32>
    tpu.vector_store %arg4[%c0_1, %c0_2, %c0_3], %3 {strides = array<i32>} : memref<5x8x128xf32, #tpu.memory_space<vmem>>, vector<5x8x128xf32>,
    %c1_i32 = arith.constant 1 : i32
    %5 = arith.muli %arg0, %c1_i32 : i32
    %c0_i32 = arith.constant 0 : i32
    %6 = arith.addi %5, %c0_i32 : i32
    %c5_i32 = arith.constant 5 : i32
    %7 = arith.muli %6, %c5_i32 : i32
    %c5_i32_4 = arith.constant 5 : i32
    %8 = arith.minsi %7, %c5_i32_4 : i32
    %c0_i32_5 = arith.constant 0 : i32
    %c1_i32_6 = arith.constant 1 : i32
    %c0_i32_7 = arith.constant 0 : i32
    %9 = tpu.memref_slice %arg3[%8, %c1_i32_6, %c0_i32_7] : memref<10x24x128xf32, #tpu.memory_space<any>> -> memref<5x8x128xf32, #tpu.memory_space<any>>
    %10 = tpu.memref_slice %arg5[%c0_i32_5] : memref<4x!tpu.dma_semaphore, #tpu.memory_space<semaphore_mem>> -> memref<1x!tpu.dma_semaphore, #tpu.memory_space<semaphore_mem>>
    %11 = tpu.memref_squeeze %10 : memref<1x!tpu.dma_semaphore, #tpu.memory_space<semaphore_mem>> -> memref<!tpu.dma_semaphore, #tpu.memory_space<semaphore_mem>>
    tpu.enqueue_dma source(%arg4 : memref<5x8x128xf32, #tpu.memory_space<vmem>>) target(%9 : memref<5x8x128xf32, #tpu.memory_space<any>>) target_semaphore(%11 : memref<!tpu.dma_semaphore, #tpu.memory_space<semaphore_mem>>)
    %c0_i32_8 = arith.constant 0 : i32
    %c0_i32_9 = arith.constant 0 : i32
    %c1_i32_10 = arith.constant 1 : i32
    %c0_i32_11 = arith.constant 0 : i32
    %12 = tpu.memref_slice %arg3[%c0_i32_9, %c1_i32_10, %c0_i32_11] : memref<10x24x128xf32, #tpu.memory_space<any>> -> memref<5x8x128xf32, #tpu.memory_space<any>>
    %13 = tpu.memref_slice %arg5[%c0_i32_8] : memref<4x!tpu.dma_semaphore, #tpu.memory_space<semaphore_mem>> -> memref<1x!tpu.dma_semaphore, #tpu.memory_space<semaphore_mem>>
    %14 = tpu.memref_squeeze %13 : memref<1x!tpu.dma_semaphore, #tpu.memory_space<semaphore_mem>> -> memref<!tpu.dma_semaphore, #tpu.memory_space<semaphore_mem>>
    tpu.wait_dma2 semaphore(%14 : memref<!tpu.dma_semaphore, #tpu.memory_space<semaphore_mem>>) src(%arg4 : memref<5x8x128xf32, #tpu.memory_space<vmem>>) dst(%12 : memref<5x8x128xf32, #tpu.memory_space<any>>)
    return
  }
  func.func @transform_0(%arg0: i32) -> (i32, i32) {
    %c0_i32 = arith.constant 0 : i32
    %c0_i32_0 = arith.constant 0 : i32
    %c0_i32_1 = arith.constant 0 : i32
    return %c0_i32, %c0_i32_0 : i32, i32
  }
}

</mosaic_0001>

<bundles_post_ra>
// kernel: prompt_learner_forward.1
= control target key start
LH: loop header
LB: loop body
LE: loop exit
PB: predicated region body
PF: predicated region fallthrough
CT: control target
= control target key end

     0   :  { %7 = vsyncpa [#allocation5], 0  ;;  %s250_s9 = smov 0   ;;  %s292_s0 = inlined_call_operand.hbm [shape: f32[8,128], index: 0, kind: input, shape index: {}]   ;;  %s293_s1 = inlined_call_operand.hbm [shape: f32[10,24,128], index: 1, kind: input, shape index: {}, may-alias: {1,2}]   ;;  %s294_s2 = inlined_call_operand.hbm [shape: f32[10,24,128], index: 2, kind: output, shape index: {}, may-alias: {1,2}]  }
   0x1 LB: > { %s230_s10 = smov [#allocation4]   ;;  %s131_s12 = sadd.s32 4294967295, %s228_s9   ;;  %s228_s9 = sphi %s250_s9, %s13_s9  }
   0x2   : > { %s42_s11 = sshll.u32 %s230_s10, 4  ;;  %p133_p0 = scmp.lt.s32.totalorder %s228_s9, 1  ;;  %s43_s11 = int_to_ptr.vmem [resolvable:$true] %s42_s11 }
   0x3   : > { %p151_p1 = scmp.ge.s32.totalorder %s228_s9, 1  ;;  %p258_p2 = scmp.eq.s32.totalorder %s131_s12, 0 }
   0x4   : > { %s178_s13 = scalar_lea.vmem %s43_s11, 128  ;;  %p186_p8 = scmp.lt.s32.totalorder %s43_s11, %s43_s11 }
   0x5   : > { %p148_p3 = pnand %p258_p2, %p151_p1  ;;  %p179_p5 = scmp.ne.s32.totalorder %s43_s11, %s178_s13 }
   0x6   : > { %p187_p9 = scmp.lt.s32.totalorder %s178_s13, %s178_s13 }
   0x7   : > { %p169_p4 = pneg %p148_p3 }
   0x8   : > { %p188_p10 = por %p187_p9, %p186_p8 }
   0x9   : > { %p181_p6 = pnand %p179_p5, %p169_p4 }
   0xb   : > { %p182_p7 = pneg %p181_p6 }
   0xd   : > { %p189_p11 = pnand %p188_p10, %p182_p7 }
   0xf   : > { %192 = shalt.err (!%p189_p11)
}
  0x10   : > { %150 = dma.hbm_to_vmem [thread:$0]  (!%p148_p3), %s292_s0, 128, %s43_s11, [#allocation5]  }
  0x11   : > { %53 = sbr.rel (%p133_p0) target bundleno = 48 (0x30), region = 24 }
  0x16   : > { %221 = dma.done.wait (%p258_p2), [#allocation5], 128  }
  0x17   : > { %223 = vsyncadd (%p258_p2), [#allocation5], 4294967168  ;;  %s67_s16 = smul.u32 5, %s131_s12  ;;  %s231_s17 = smov [#allocation2]   ;;  %v61_v0 = vld [vmem:[#allocation4] sm:$0xff] }
  0x18   : > { %s75_s18 = sshll.u32 %s231_s17, 4  ;;  %62 = vst [vmem:[#allocation2] sm:$0xff] %v61_v0  ;;  %63 = vst [vmem:[#allocation2 + $0x8] sm:$0xff] %v61_v0  ;;  %s273_s18 = int_to_ptr.vmem [resolvable:$true] %s75_s18 }
  0x19   : > { %p68_p12 = scmp.lt.s32.totalorder %s67_s16, 5  ;;  %64 = vst [vmem:[#allocation2 + $0x10] sm:$0xff] %v61_v0  ;;  %65 = vst [vmem:[#allocation2 + $0x18] sm:$0xff] %v61_v0  ;;  %s193_s24 = scalar_lea.vmem %s273_s18, 640 }
  0x1a   : > { %66 = vst [vmem:[#allocation2 + $0x20] sm:$0xff] %v61_v0  ;;  %p194_p13 = scmp.ne.s32.totalorder %s273_s18, %s193_s24  ;;  %p198_p0 = scmp.lt.s32.totalorder %s273_s18, %s273_s18 }
  0x1b   : > { %s297_s16 = smov (!%p68_p12, %s67_s16), 5  ;;  %p199_p1 = scmp.lt.s32.totalorder %s193_s24, %s193_s24 }
  0x1c   : > { %s138_s19 = smul.u32 384, %s297_s16 }
  0x1d   : > { %p200_p2 = por %p199_p1, %p198_p0 }
  0x1e   : > { %s115_s22 = scalar_lea.hbm %s294_s2, %s138_s19 }
  0x1f   : > { %s116_s23 = scalar_lea.hbm %s115_s22, 16  ;;  %p201_p3 = pnand %p200_p2, %p194_p13 }
  0x21   : > { %204 = shalt.err (!%p201_p3)  }
  0x22   : > { %s215_s25 = scalar_lea.hbm %s115_s22, 656  ;;  %s207_s28 = scalar_lea.hbm %s294_s2, 3840 }
  0x23   : > { %p206_p4 = scmp.ne.s32.totalorder %s116_s23, %s215_s25  ;;  %p208_p5 = scmp.lt.s32.totalorder %s116_s23, %s294_s2 }
  0x24   : > { %p209_p6 = scmp.lt.s32.totalorder %s207_s28, %s215_s25 }
  0x26   : > { %p210_p7 = por %p209_p6, %p208_p5 }
  0x28   : > { %p211_p8 = pnand %p210_p7, %p206_p4 }
  0x2a   : > { %214 = shalt.err (!%p211_p8)  }
  0x2b   : > { %s232_s3 = smov 128   ;;  %s233_s4 = smov 384  }
  0x2c   : > { %s234_s5 = smov 8  }
  0x2d   : > { %78 = dma.vmem_to_hbm [thread:$0]  %s273_s18, 640, %s116_s23, [#allocation3], %s232_s3, %s233_s4, %s234_s5 }
  0x2e   : > { %224 = dma.done.wait [#allocation3], 640 }
  0x2f   : > { %225 = vsyncadd [#allocation3], 4294966656 }
  0x30 PF: > { %s13_s9 = sadd.s32 1, %s228_s9  }
  0x31   : > { %p10_p9 = scmp.ge.s32.totalorder %s13_s9, 3  }
  0x33   :  { %12 = sbr.rel (!%p10_p9) target bundleno = 1 (0x1), region = 44 }
  0x38   :  { %83 = vsyncpa [#allocation5], 1 }
  0x39   :  { %85 = vsyncpa [#allocation5 + $0x1], 1 }
  0x3a   :  { %86 = vsyncmov [#allocation3] }
  0x3d   :  { %s87_s6 = vpop.sfrf %86 }
  0x3e   :  { %p139_p10 = scmp.ne.s32.totalorder %s87_s6, 0 }
  0x40   :  { %91 = shalt.err (%p139_p10)  }
  0x41   :  { %93 = vsyncmov [#allocation3 + $0x1] }
  0x44   :  { %s94_s7 = vpop.sfrf %93 }
  0x45   :  { %p140_p11 = scmp.ne.s32.totalorder %s94_s7, 0 }
  0x47   :  { %98 = shalt.err (%p140_p11)  }
  0x48   :  { %100 = vsyncmov [#allocation3 + $0x2] }
  0x4b   :  { %s101_s8 = vpop.sfrf %100 }
  0x4c   :  { %p141_p12 = scmp.ne.s32.totalorder %s101_s8, 0 }
  0x4e   :  { %105 = shalt.err (%p141_p12)  }
  0x4f   :  { %107 = vsyncmov [#allocation3 + $0x3] }
  0x52   :  { %s108_s10 = vpop.sfrf %107 }
  0x53   :  { %p142_p13 = scmp.ne.s32.totalorder %s108_s10, 0 }
  0x55   :  { %112 = shalt.err (%p142_p13)  }

</bundles_post_ra>
